<compile_context>
chip_gen: v7x
topology: tpu7x:2x2x1
jax: 0.10.0
libtpu: 0.0.40
codegen_flags: <defaults>
</compile_context>

<pallas_src>
import functools

import jax
import jax.numpy as jnp
from jax.experimental import pallas as pl
from jax.experimental.pallas import tpu as pltpu


def _round_up(x, m):
    return ((x + m - 1) // m) * m


def gcn_layer_kernel(a_ref, h_ref, w_ref, b_ref, out_ref, acc_ref, *, relu_input):
    """One GCNConv layer, tiled over (row_tile i, source_tile k).

    a_ref   : (TM, TK)  bf16   tile of normalized adjacency A_hat
    h_ref   : (TK, Fin) f32    tile of input node features
    w_ref   : (Fin, Fout) f32  dense weight (padded to lane-dense width)
    b_ref   : (1, Fout) f32    bias (padded)
    out_ref : (TM, Fout) f32   output row band
    acc_ref : (TM, Fout) f32   VMEM accumulator, resident across the k axis
    """
    k = pl.program_id(1)

    @pl.when(k == 0)
    def _():
        acc_ref[...] = jnp.zeros_like(acc_ref)

    h = h_ref[...]
    if relu_input:                      # conv2 consumes relu(x_emb); dropout is identity in eval
        h = jnp.maximum(h, 0.0)

    # Fused small dense transform for this source tile: (TK, Fin) @ (Fin, Fout).
    hw = jnp.dot(h, w_ref[...], preferred_element_type=jnp.float32)

    # Aggregation on the MXU in bf16 with f32 accumulation: (TM, TK) @ (TK, Fout).
    acc_ref[...] += jnp.dot(
        a_ref[...], hw.astype(jnp.bfloat16), preferred_element_type=jnp.float32
    )

    @pl.when(k == pl.num_programs(1) - 1)
    def _():
        out_ref[...] = acc_ref[...] + b_ref[...]


def _vmem_limit_bytes(tm, tk, fin, fout):
    est = (
        2 * tm * tk * 2        # A tiles (bf16), double-buffered
        + 2 * tk * fin * 4     # feature tiles, double-buffered
        + 2 * fin * fout * 4   # weight
        + 2 * 1 * fout * 4     # bias
        + 2 * tm * fout * 4    # output band (double-buffered writeback)
        + tm * fout * 4        # accumulator
    )
    return min(max(est + (8 << 20), 16 << 20), 48 << 20)


def gcn_layer(a_bf16, h, w, b, *, tm, tk, relu_input):
    n_pad = a_bf16.shape[0]
    fin = h.shape[1]
    fout = w.shape[1]
    grid = (n_pad // tm, n_pad // tk)

    kernel = functools.partial(gcn_layer_kernel, relu_input=relu_input)
    return pl.pallas_call(
        kernel,
        out_shape=jax.ShapeDtypeStruct((n_pad, fout), jnp.float32),
        grid_spec=pltpu.PrefetchScalarGridSpec(
            num_scalar_prefetch=0,
            grid=grid,
            in_specs=[
                pl.BlockSpec((tm, tk), lambda i, k: (i, k)),      # A_hat tile
                pl.BlockSpec((tk, fin), lambda i, k: (k, 0)),     # source features
                pl.BlockSpec((fin, fout), lambda i, k: (0, 0)),   # dense weight
                pl.BlockSpec((1, fout), lambda i, k: (0, 0)),     # bias
            ],
            out_specs=pl.BlockSpec((tm, fout), lambda i, k: (i, 0)),
            scratch_shapes=[pltpu.VMEM((tm, fout), jnp.float32)],
        ),
        compiler_params=pltpu.CompilerParams(
            dimension_semantics=("parallel", "arbitrary"),
            vmem_limit_bytes=_vmem_limit_bytes(tm, tk, fin, fout),
        ),
    )(a_bf16, h, w, b)


def gcn_forward(a_hat, x, w1, b1, w2, b2):
    """Net.forward: returns (logits, x_emb)."""
    n, in_size = x.shape
    hid = w1.shape[1]
    out_size = w2.shape[1]

    # --- tile selection (lane/sublane aligned; larger tiles for larger graphs) ---
    if n <= 512 - 1 and _round_up(n, 128) < 512:
        tm, tk = 128, 128
        n_pad = _round_up(n, 128)
    else:
        tm, tk = 256, 512
        n_pad = _round_up(n, 512)

    # --- pad feature dims to 128 (lane-dense outputs / full MXU columns) ---
    fin_p = _round_up(in_size, 128)
    hid_p = _round_up(hid, 128)
    out_p = _round_up(out_size, 128)

    a_p = jnp.zeros((n_pad, n_pad), jnp.bfloat16).at[:n, :n].set(
        a_hat.astype(jnp.bfloat16)
    )
    x_p = jnp.zeros((n_pad, fin_p), jnp.float32).at[:n, :in_size].set(x)
    w1_p = jnp.zeros((fin_p, hid_p), jnp.float32).at[:in_size, :hid].set(w1)
    b1_p = jnp.zeros((1, hid_p), jnp.float32).at[:, :hid].set(b1)
    w2_p = jnp.zeros((hid_p, out_p), jnp.float32).at[:hid, :out_size].set(w2)
    b2_p = jnp.zeros((1, out_p), jnp.float32).at[:, :out_size].set(b2)

    # conv1 (no input activation); emb kept pre-ReLU as the module returns it.
    emb_p = gcn_layer(a_p, x_p, w1_p, b1_p, tm=tm, tk=tk, relu_input=False)
    # relu + dropout(eval)=identity + conv2; relu fused per source tile in-kernel.
    out_p_arr = gcn_layer(a_p, emb_p, w2_p, b2_p, tm=tm, tk=tk, relu_input=True)

    return out_p_arr[:n, :out_size], emb_p[:n, :hid]


def build_normalized_adjacency(edge_index, edge_weight, num_nodes):
    """Dense GCN-normalized adjacency: D^-1/2 (A + I) D^-1/2 (glue, plain JAX)."""
    src = edge_index[0]
    dst = edge_index[1]
    loop = jnp.arange(num_nodes, dtype=edge_index.dtype)
    src = jnp.concatenate([src, loop])
    dst = jnp.concatenate([dst, loop])
    w = jnp.concatenate([edge_weight, jnp.ones((num_nodes,), edge_weight.dtype)])
    a = jnp.zeros((num_nodes, num_nodes), jnp.float32).at[dst, src].add(w)
    deg = a.sum(axis=1)
    dinv = jnp.where(deg > 0, jax.lax.rsqrt(deg), 0.0)
    return dinv[:, None] * a * dinv[None, :]


if __name__ == "__main__":
    key = jax.random.PRNGKey(0)
    k_x, k_src, k_dst, k_w, k_w1, k_w2 = jax.random.split(key, 6)

    # Small synthetic graph consistent with Net(in_size=16, hid_size=8, out_size=2)
    num_nodes, num_edges = 16, 40
    in_size, hid_size, out_size = 16, 8, 2

    x = jax.random.normal(k_x, (num_nodes, in_size), jnp.float32)
    edge_index = jnp.stack([
        jax.random.randint(k_src, (num_edges,), 0, num_nodes),
        jax.random.randint(k_dst, (num_edges,), 0, num_nodes),
    ]).astype(jnp.int32)
    edge_weight = jax.random.uniform(k_w, (num_edges,), jnp.float32, 0.1, 1.0)

    lim1 = (6.0 / (in_size + hid_size)) ** 0.5
    lim2 = (6.0 / (hid_size + out_size)) ** 0.5
    w1 = jax.random.uniform(k_w1, (in_size, hid_size), jnp.float32, -lim1, lim1)
    w2 = jax.random.uniform(k_w2, (hid_size, out_size), jnp.float32, -lim2, lim2)
    b1 = jnp.zeros((1, hid_size), jnp.float32)
    b2 = jnp.zeros((1, out_size), jnp.float32)

    a_hat = build_normalized_adjacency(edge_index, edge_weight, num_nodes)

    out, x_emb = jax.block_until_ready(
        jax.jit(gcn_forward)(a_hat, x, w1, b1, w2, b2)
    )

    # Pure-JAX f32 reference (tolerances loosened: A_hat / XW go through bf16).
    emb_ref = a_hat @ (x @ w1) + b1
    out_ref = a_hat @ (jnp.maximum(emb_ref, 0.0) @ w2) + b2
    assert out.shape == (num_nodes, out_size) and x_emb.shape == (num_nodes, hid_size)
    assert jnp.allclose(x_emb, emb_ref, atol=3e-2, rtol=3e-2), "x_emb mismatch"
    assert jnp.allclose(out, out_ref, atol=3e-2, rtol=3e-2), "out mismatch"

    print("KERNEL_OK")
</pallas_src>

<mosaic_0001>
module attributes {stable_mosaic.version = 11 : i64} {
  func.func @gcn_layer_kernel(%arg0: i32, %arg1: i32, %arg2: memref<128x128xbf16, #tpu.memory_space<vmem>>, %arg3: memref<128x128xf32, #tpu.memory_space<vmem>>, %arg4: memref<128x128xf32, #tpu.memory_space<vmem>>, %arg5: memref<1x128xf32, #tpu.memory_space<vmem>>, %arg6: memref<128x128xf32, #tpu.memory_space<vmem>>, %arg7: memref<128x128xf32, #tpu.memory_space<vmem>>) attributes {dimension_semantics = [#tpu.dimension_semantics<parallel>, #tpu.dimension_semantics<arbitrary>], iteration_bounds = array<i64: 1, 1>, scalar_prefetch = 0 : i64, scratch_operands = 1 : i64, tpu.core_type = #tpu.core_type<tc>, window_params = [{transform_indices = @transform_0, window_bounds = array<i64: 128, 128>}, {transform_indices = @transform_1, window_bounds = array<i64: 128, 128>}, {pipeline_mode = #tpu.pipeline_mode<synchronous>, transform_indices = @transform_2, window_bounds = array<i64: 128, 128>}, {pipeline_mode = #tpu.pipeline_mode<synchronous>, transform_indices = @transform_3, window_bounds = array<i64: 1, 128>}, {transform_indices = @transform_4, window_bounds = array<i64: 128, 128>}]} {
    %c0_i32 = arith.constant 0 : i32
    %0 = arith.cmpi eq, %arg1, %c0_i32 : i32
    %1 = arith.extui %0 : i1 to i32
    %c0_i32_0 = arith.constant 0 : i32
    %2 = arith.cmpi ne, %1, %c0_i32_0 : i32
    scf.if %2 {
      %cst_13 = arith.constant 0.000000e+00 : f32
      %15 = vector.broadcast %cst_13 : f32 to vector<128x128xf32>
      %c0_14 = arith.constant 0 : index
      %c0_15 = arith.constant 0 : index
      %16 = vector.load %arg7[%c0_14, %c0_15] : memref<128x128xf32, #tpu.memory_space<vmem>>, vector<128x128xf32>
      tpu.vector_store %arg7[%c0_14, %c0_15], %15 {strides = array<i32>} : memref<128x128xf32, #tpu.memory_space<vmem>>, vector<128x128xf32>,
    } else {
    }
    %c0 = arith.constant 0 : index
    %c0_1 = arith.constant 0 : index
    %3 = vector.load %arg3[%c0, %c0_1] : memref<128x128xf32, #tpu.memory_space<vmem>>, vector<128x128xf32>
    %c0_2 = arith.constant 0 : index
    %c0_3 = arith.constant 0 : index
    %4 = vector.load %arg4[%c0_2, %c0_3] : memref<128x128xf32, #tpu.memory_space<vmem>>, vector<128x128xf32>
    %cst = arith.constant dense<0.000000e+00> : vector<128x128xf32>
    %5 = tpu.matmul %3, %4, %cst {dimension_numbers = #tpu.dot_dimension_numbers<[1], [0], [0], [1], [0, 0, 1, 1], [], []>} : vector<128x128xf32>, vector<128x128xf32>, vector<128x128xf32> -> vector<128x128xf32>
    %c0_4 = arith.constant 0 : index
    %c0_5 = arith.constant 0 : index
    %6 = vector.load %arg7[%c0_4, %c0_5] : memref<128x128xf32, #tpu.memory_space<vmem>>, vector<128x128xf32>
    %c0_6 = arith.constant 0 : index
    %c0_7 = arith.constant 0 : index
    %7 = vector.load %arg2[%c0_6, %c0_7] : memref<128x128xbf16, #tpu.memory_space<vmem>>, vector<128x128xbf16>
    %8 = arith.truncf %5 : vector<128x128xf32> to vector<128x128xbf16>
    %cst_8 = arith.constant dense<0.000000e+00> : vector<128x128xf32>
    %9 = tpu.matmul %7, %8, %cst_8 {dimension_numbers = #tpu.dot_dimension_numbers<[1], [0], [0], [1], [0, 0, 1, 1], [], []>} : vector<128x128xbf16>, vector<128x128xbf16>, vector<128x128xf32> -> vector<128x128xf32>
    %10 = arith.addf %6, %9 : vector<128x128xf32>
    %c0_9 = arith.constant 0 : index
    %c0_10 = arith.constant 0 : index
    %11 = vector.load %arg7[%c0_9, %c0_10] : memref<128x128xf32, #tpu.memory_space<vmem>>, vector<128x128xf32>
    tpu.vector_store %arg7[%c0_9, %c0_10], %10 {strides = array<i32>} : memref<128x128xf32, #tpu.memory_space<vmem>>, vector<128x128xf32>,
    %c0_i32_11 = arith.constant 0 : i32
    %12 = arith.cmpi eq, %arg1, %c0_i32_11 : i32
    %13 = arith.extui %12 : i1 to i32
    %c0_i32_12 = arith.constant 0 : i32
    %14 = arith.cmpi ne, %13, %c0_i32_12 : i32
    scf.if %14 {
      %c0_13 = arith.constant 0 : index
      %c0_14 = arith.constant 0 : index
      %15 = vector.load %arg7[%c0_13, %c0_14] : memref<128x128xf32, #tpu.memory_space<vmem>>, vector<128x128xf32>
      %c0_15 = arith.constant 0 : index
      %c0_16 = arith.constant 0 : index
      %16 = vector.load %arg5[%c0_15, %c0_16] : memref<1x128xf32, #tpu.memory_space<vmem>>, vector<1x128xf32>
      %17 = vector.broadcast %16 : vector<1x128xf32> to vector<128x128xf32>
      %18 = arith.addf %15, %17 : vector<128x128xf32>
      %c0_17 = arith.constant 0 : index
      %c0_18 = arith.constant 0 : index
      %19 = vector.load %arg6[%c0_17, %c0_18] : memref<128x128xf32, #tpu.memory_space<vmem>>, vector<128x128xf32>
      tpu.vector_store %arg6[%c0_17, %c0_18], %18 {strides = array<i32>} : memref<128x128xf32, #tpu.memory_space<vmem>>, vector<128x128xf32>,
    } else {
    }
    return
  }
  func.func @transform_0(%arg0: i32, %arg1: i32) -> (i32, i32) {
    %c0_i32 = arith.constant 0 : i32
    return %arg0, %arg1 : i32, i32
  }
  func.func @transform_1(%arg0: i32, %arg1: i32) -> (i32, i32) {
    %c0_i32 = arith.constant 0 : i32
    %c0_i32_0 = arith.constant 0 : i32
    return %arg1, %c0_i32 : i32, i32
  }
  func.func @transform_2(%arg0: i32, %arg1: i32) -> (i32, i32) {
    %c0_i32 = arith.constant 0 : i32
    %c0_i32_0 = arith.constant 0 : i32
    %c0_i32_1 = arith.constant 0 : i32
    return %c0_i32, %c0_i32_0 : i32, i32
  }
  func.func @transform_3(%arg0: i32, %arg1: i32) -> (i32, i32) {
    %c0_i32 = arith.constant 0 : i32
    %c0_i32_0 = arith.constant 0 : i32
    %c0_i32_1 = arith.constant 0 : i32
    return %c0_i32, %c0_i32_0 : i32, i32
  }
  func.func @transform_4(%arg0: i32, %arg1: i32) -> (i32, i32) {
    %c0_i32 = arith.constant 0 : i32
    %c0_i32_0 = arith.constant 0 : i32
    return %arg0, %c0_i32 : i32, i32
  }
}

module attributes {stable_mosaic.version = 11 : i64} {
  func.func @gcn_layer_kernel(%arg0: i32, %arg1: i32, %arg2: memref<128x128xbf16, #tpu.memory_space<vmem>>, %arg3: memref<128x128xf32, #tpu.memory_space<vmem>>, %arg4: memref<128x128xf32, #tpu.memory_space<vmem>>, %arg5: memref<1x128xf32, #tpu.memory_space<vmem>>, %arg6: memref<128x128xf32, #tpu.memory_space<vmem>>, %arg7: memref<128x128xf32, #tpu.memory_space<vmem>>) attributes {dimension_semantics = [#tpu.dimension_semantics<parallel>, #tpu.dimension_semantics<arbitrary>], iteration_bounds = array<i64: 1, 1>, scalar_prefetch = 0 : i64, scratch_operands = 1 : i64, tpu.core_type = #tpu.core_type<tc>, window_params = [{transform_indices = @transform_0, window_bounds = array<i64: 128, 128>}, {transform_indices = @transform_1, window_bounds = array<i64: 128, 128>}, {pipeline_mode = #tpu.pipeline_mode<synchronous>, transform_indices = @transform_2, window_bounds = array<i64: 128, 128>}, {pipeline_mode = #tpu.pipeline_mode<synchronous>, transform_indices = @transform_3, window_bounds = array<i64: 1, 128>}, {transform_indices = @transform_4, window_bounds = array<i64: 128, 128>}]} {
    %c0_i32 = arith.constant 0 : i32
    %0 = arith.cmpi eq, %arg1, %c0_i32 : i32
    %1 = arith.extui %0 : i1 to i32
    %c0_i32_0 = arith.constant 0 : i32
    %2 = arith.cmpi ne, %1, %c0_i32_0 : i32
    scf.if %2 {
      %cst_14 = arith.constant 0.000000e+00 : f32
      %17 = vector.broadcast %cst_14 : f32 to vector<128x128xf32>
      %c0_15 = arith.constant 0 : index
      %c0_16 = arith.constant 0 : index
      %18 = vector.load %arg7[%c0_15, %c0_16] : memref<128x128xf32, #tpu.memory_space<vmem>>, vector<128x128xf32>
      tpu.vector_store %arg7[%c0_15, %c0_16], %17 {strides = array<i32>} : memref<128x128xf32, #tpu.memory_space<vmem>>, vector<128x128xf32>,
    } else {
    }
    %c0 = arith.constant 0 : index
    %c0_1 = arith.constant 0 : index
    %3 = vector.load %arg3[%c0, %c0_1] : memref<128x128xf32, #tpu.memory_space<vmem>>, vector<128x128xf32>
    %cst = arith.constant 0.000000e+00 : f32
    %4 = vector.broadcast %cst : f32 to vector<128x128xf32>
    %5 = arith.maximumf %3, %4 : vector<128x128xf32>
    %c0_2 = arith.constant 0 : index
    %c0_3 = arith.constant 0 : index
    %6 = vector.load %arg4[%c0_2, %c0_3] : memref<128x128xf32, #tpu.memory_space<vmem>>, vector<128x128xf32>
    %cst_4 = arith.constant dense<0.000000e+00> : vector<128x128xf32>
    %7 = tpu.matmul %5, %6, %cst_4 {dimension_numbers = #tpu.dot_dimension_numbers<[1], [0], [0], [1], [0, 0, 1, 1], [], []>} : vector<128x128xf32>, vector<128x128xf32>, vector<128x128xf32> -> vector<128x128xf32>
    %c0_5 = arith.constant 0 : index
    %c0_6 = arith.constant 0 : index
    %8 = vector.load %arg7[%c0_5, %c0_6] : memref<128x128xf32, #tpu.memory_space<vmem>>, vector<128x128xf32>
    %c0_7 = arith.constant 0 : index
    %c0_8 = arith.constant 0 : index
    %9 = vector.load %arg2[%c0_7, %c0_8] : memref<128x128xbf16, #tpu.memory_space<vmem>>, vector<128x128xbf16>
    %10 = arith.truncf %7 : vector<128x128xf32> to vector<128x128xbf16>
    %cst_9 = arith.constant dense<0.000000e+00> : vector<128x128xf32>
    %11 = tpu.matmul %9, %10, %cst_9 {dimension_numbers = #tpu.dot_dimension_numbers<[1], [0], [0], [1], [0, 0, 1, 1], [], []>} : vector<128x128xbf16>, vector<128x128xbf16>, vector<128x128xf32> -> vector<128x128xf32>
    %12 = arith.addf %8, %11 : vector<128x128xf32>
    %c0_10 = arith.constant 0 : index
    %c0_11 = arith.constant 0 : index
    %13 = vector.load %arg7[%c0_10, %c0_11] : memref<128x128xf32, #tpu.memory_space<vmem>>, vector<128x128xf32>
    tpu.vector_store %arg7[%c0_10, %c0_11], %12 {strides = array<i32>} : memref<128x128xf32, #tpu.memory_space<vmem>>, vector<128x128xf32>,
    %c0_i32_12 = arith.constant 0 : i32
    %14 = arith.cmpi eq, %arg1, %c0_i32_12 : i32
    %15 = arith.extui %14 : i1 to i32
    %c0_i32_13 = arith.constant 0 : i32
    %16 = arith.cmpi ne, %15, %c0_i32_13 : i32
    scf.if %16 {
      %c0_14 = arith.constant 0 : index
      %c0_15 = arith.constant 0 : index
      %17 = vector.load %arg7[%c0_14, %c0_15] : memref<128x128xf32, #tpu.memory_space<vmem>>, vector<128x128xf32>
      %c0_16 = arith.constant 0 : index
      %c0_17 = arith.constant 0 : index
      %18 = vector.load %arg5[%c0_16, %c0_17] : memref<1x128xf32, #tpu.memory_space<vmem>>, vector<1x128xf32>
      %19 = vector.broadcast %18 : vector<1x128xf32> to vector<128x128xf32>
      %20 = arith.addf %17, %19 : vector<128x128xf32>
      %c0_18 = arith.constant 0 : index
      %c0_19 = arith.constant 0 : index
      %21 = vector.load %arg6[%c0_18, %c0_19] : memref<128x128xf32, #tpu.memory_space<vmem>>, vector<128x128xf32>
      tpu.vector_store %arg6[%c0_18, %c0_19], %20 {strides = array<i32>} : memref<128x128xf32, #tpu.memory_space<vmem>>, vector<128x128xf32>,
    } else {
    }
    return
  }
  func.func @transform_0(%arg0: i32, %arg1: i32) -> (i32, i32) {
    %c0_i32 = arith.constant 0 : i32
    return %arg0, %arg1 : i32, i32
  }
  func.func @transform_1(%arg0: i32, %arg1: i32) -> (i32, i32) {
    %c0_i32 = arith.constant 0 : i32
    %c0_i32_0 = arith.constant 0 : i32
    return %arg1, %c0_i32 : i32, i32
  }
  func.func @transform_2(%arg0: i32, %arg1: i32) -> (i32, i32) {
    %c0_i32 = arith.constant 0 : i32
    %c0_i32_0 = arith.constant 0 : i32
    %c0_i32_1 = arith.constant 0 : i32
    return %c0_i32, %c0_i32_0 : i32, i32
  }
  func.func @transform_3(%arg0: i32, %arg1: i32) -> (i32, i32) {
    %c0_i32 = arith.constant 0 : i32
    %c0_i32_0 = arith.constant 0 : i32
    %c0_i32_1 = arith.constant 0 : i32
    return %c0_i32, %c0_i32_0 : i32, i32
  }
  func.func @transform_4(%arg0: i32, %arg1: i32) -> (i32, i32) {
    %c0_i32 = arith.constant 0 : i32
    %c0_i32_0 = arith.constant 0 : i32
    return %arg0, %c0_i32 : i32, i32
  }
}

</mosaic_0001>

<bundles_post_ra>
// kernel: gcn_forward.2
= control target key start
LH: loop header
LB: loop body
LE: loop exit
PB: predicated region body
PF: predicated region fallthrough
CT: control target
= control target key end

     0   :  { %s875_s2 = inlined_call_operand.vmem [shape: f32[128,128], index: 2, kind: input, shape index: {}]   ;;  %s876_s1 = inlined_call_operand.vmem [shape: f32[128,128], index: 1, kind: input, shape index: {}]   ;;  %s877_s0 = inlined_call_operand.vmem [shape: bf16[128,128], index: 0, kind: input, shape index: {}]   ;;  %s878_s3 = inlined_call_operand.vmem [shape: f32[1,128], index: 3, kind: input, shape index: {}]   ;;  %s879_s4 = inlined_call_operand.vmem [shape: f32[128,128], index: 4, kind: output, shape index: {}]  }
   0x1   :  { %v54_v0 = vld [vmem:[%s875_s2] sm:$0xff]  ;;  %v55_v1 = vld [vmem:[%s875_s2 + $0x8] sm:$0xff]  ;;  %v56_v2 = vld [vmem:[%s875_s2 + $0x10] sm:$0xff] }
   0x2   :  { %v639_v3 = vpack.c.bf16 %v55_v1, %v54_v0  ;;  %v57_v4 = vld [vmem:[%s875_s2 + $0x18] sm:$0xff]  ;;  %v58_v6 = vld [vmem:[%s875_s2 + $0x20] sm:$0xff]  ;;  %v59_v7 = vld [vmem:[%s875_s2 + $0x28] sm:$0xff] }
   0x3   :  { %v643_v5 = vpack.c.bf16 %v57_v4, %v56_v2  ;;  %v647_v8 = vpack.c.bf16 %v59_v7, %v58_v6  ;;  %v38_v9 = vld [vmem:[%s876_s1] sm:$0xff]  ;;  %v60_v10 = vld [vmem:[%s875_s2 + $0x30] sm:$0xff]  ;;  %v61_v11 = vld [vmem:[%s875_s2 + $0x38] sm:$0xff] }
   0x4   :  { %640 = vmatprep.subr.bf16.mxu0 %v639_v3  ;;  %583 = vmatprep.mubr.f32.mxu0 %v38_v9  ;;  %v651_v12 = vpack.c.bf16 %v61_v11, %v60_v10  ;;  %v62_v13 = vld [vmem:[%s875_s2 + $0x40] sm:$0xff]  ;;  %v63_v14 = vld [vmem:[%s875_s2 + $0x48] sm:$0xff]  ;;  %v64_v16 = vld [vmem:[%s875_s2 + $0x50] sm:$0xff] }
   0x5   :  { %642 = vmatpush3.bf16.msra.mxu0 %v639_v3  ;;  %v655_v15 = vpack.c.bf16 %v63_v14, %v62_v13  ;;  %v65_v17 = vld [vmem:[%s875_s2 + $0x58] sm:$0xff]  ;;  %v66_v19 = vld [vmem:[%s875_s2 + $0x60] sm:$0xff]  ;;  %v67_v20 = vld [vmem:[%s875_s2 + $0x68] sm:$0xff] }
   0x6   :  { %644 = vmatprep.subr.bf16.mxu0 %v643_v5  ;;  %v659_v18 = vpack.c.bf16 %v65_v17, %v64_v16  ;;  %v663_v21 = vpack.c.bf16 %v67_v20, %v66_v19  ;;  %v68_v22 = vld [vmem:[%s875_s2 + $0x70] sm:$0xff]  ;;  %v69_v23 = vld [vmem:[%s875_s2 + $0x78] sm:$0xff]  ;;  %v39_v25 = vld [vmem:[%s876_s1 + $0x8] sm:$0xff] }
   0x7   :  { %v667_v24 = vpack.c.bf16 %v69_v23, %v68_v22  ;;  %v40_v26 = vld [vmem:[%s876_s1 + $0x10] sm:$0xff]  ;;  %v41_v27 = vld [vmem:[%s876_s1 + $0x18] sm:$0xff]  ;;  %v42_v28 = vld [vmem:[%s876_s1 + $0x20] sm:$0xff] }
   0x8   :  { %v43_v29 = vld [vmem:[%s876_s1 + $0x28] sm:$0xff]  ;;  %v44_v30 = vld [vmem:[%s876_s1 + $0x30] sm:$0xff]  ;;  %v45_v31 = vld [vmem:[%s876_s1 + $0x38] sm:$0xff] }
   0x9   :  { %646 = vmatpush3.bf16.msra.mxu0 %v643_v5  ;;  %v46_v32 = vld [vmem:[%s876_s1 + $0x40] sm:$0xff]  ;;  %v47_v33 = vld [vmem:[%s876_s1 + $0x48] sm:$0xff]  ;;  %v48_v34 = vld [vmem:[%s876_s1 + $0x50] sm:$0xff] }
   0xa   :  { %648 = vmatprep.subr.bf16.mxu0 %v647_v8  ;;  %v49_v35 = vld [vmem:[%s876_s1 + $0x58] sm:$0xff]  ;;  %v50_v36 = vld [vmem:[%s876_s1 + $0x60] sm:$0xff]  ;;  %v51_v37 = vld [vmem:[%s876_s1 + $0x68] sm:$0xff] }
   0xb   :  { %v52_v38 = vld [vmem:[%s876_s1 + $0x70] sm:$0xff]  ;;  %v53_v39 = vld [vmem:[%s876_s1 + $0x78] sm:$0xff]  ;;  %v671_v40 = vld [vmem:[%s877_s0] sm:$0xff]  }
   0xc   :  { %623 = vmatprep.mubr.bf16.mxu1 %v671_v40  ;;  %v672_v1 = vld [vmem:[%s877_s0 + $0x8] sm:$0xff]   ;;  %v673_v2 = vld [vmem:[%s877_s0 + $0x10] sm:$0xff]   ;;  %v674_v3 = vld [vmem:[%s877_s0 + $0x18] sm:$0xff]  }
   0xd   :  { %650 = vmatpush3.bf16.msra.mxu0 %v647_v8  ;;  %v675_v4 = vld [vmem:[%s877_s0 + $0x20] sm:$0xff]   ;;  %v676_v5 = vld [vmem:[%s877_s0 + $0x28] sm:$0xff]   ;;  %v677_v6 = vld [vmem:[%s877_s0 + $0x30] sm:$0xff]  }
   0xe   :  { %652 = vmatprep.subr.bf16.mxu0 %v651_v12  ;;  %v678_v7 = vld [vmem:[%s877_s0 + $0x38] sm:$0xff]   ;;  %v502_v8 = vld [vmem:[%s878_s3] ss:$0 sm:$0xff] }
  0x11   :  { %654 = vmatpush3.bf16.msra.mxu0 %v651_v12 }
  0x12   :  { %656 = vmatprep.subr.bf16.mxu0 %v655_v15 }
  0x15   :  { %658 = vmatpush3.bf16.msra.mxu0 %v655_v15 }
  0x16   :  { %660 = vmatprep.subr.bf16.mxu0 %v659_v18 }
  0x19   :  { %662 = vmatpush3.bf16.msra.mxu0 %v659_v18 }
  0x1a   :  { %664 = vmatprep.subr.bf16.mxu0 %v663_v21 }
  0x1d   :  { %666 = vmatpush3.bf16.msra.mxu0 %v663_v21 }
  0x1e   :  { %668 = vmatprep.subr.bf16.mxu0 %v667_v24 }
  0x21   :  { %670 = vmatpush3.bf16.msra.mxu0 %v667_v24 }
  0x24   :  { %584 = vmatmul.mubr.f32.vlgmr.msra.gmra.mrb[0].mxu0 %v39_v25 }
  0x25   :  { %586 = vmatprep.mubr.f32.mxu0 %v40_v26 }
  0x28   :  { %587 = vmatmul.mubr.f32.gmra.mrb[2].mxu0 %v41_v27 }
  0x29   :  { %589 = vmatprep.mubr.f32.mxu0 %v42_v28 }
  0x2c   :  { %590 = vmatmul.mubr.f32.gmra.mrb[4].mxu0 %v43_v29 }
  0x2d   :  { %592 = vmatprep.mubr.f32.mxu0 %v44_v30 }
  0x30   :  { %593 = vmatmul.mubr.f32.gmra.mrb[6].mxu0 %v45_v31 }
  0x31   :  { %595 = vmatprep.mubr.f32.mxu0 %v46_v32 }
  0x34   :  { %596 = vmatmul.mubr.f32.gmra.mrb[8].mxu0 %v47_v33 }
  0x35   :  { %598 = vmatprep.mubr.f32.mxu0 %v48_v34 }
  0x38   :  { %599 = vmatmul.mubr.f32.gmra.mrb[10].mxu0 %v49_v35 }
  0x39   :  { %601 = vmatprep.mubr.f32.mxu0 %v50_v36 }
  0x3c   :  { %602 = vmatmul.mubr.f32.gmra.mrb[12].mxu0 %v51_v37 }
  0x3d   :  { %604 = vmatprep.mubr.f32.mxu0 %v52_v38 }
  0x40   :  { %605 = vmatmul.mubr.f32.gmra.mrb[14].mxu0 %v53_v39 }
  0xf7   :  { %v585_v41 = vpop.f32.mrb[0].mxu0 }
  0xf8   :  { %v136_v42 = vpop.f32.mrb[1].mxu0 }
  0xf9   :  { %v247_v43 = vpack.c.bf16 %v585_v41, %v136_v42 }
  0xfb   :  { %v588_v44 = vpop.f32.mrb[2].mxu0  ;;  %607 = vmatprep.subr.bf16.mxu1 %v247_v43 }
  0xfc   :  { %v146_v45 = vpop.f32.mrb[3].mxu0  ;;  %608 = vmatpush3.bf16.msra.mxu1 %v247_v43 }
  0xfd   :  { %v248_v46 = vpack.c.bf16 %v588_v44, %v146_v45 }
  0xff   :  { %v591_v47 = vpop.f32.mrb[4].mxu0  ;;  %609 = vmatprep.subr.bf16.mxu1 %v248_v46 }
 0x100   :  { %v156_v48 = vpop.f32.mrb[5].mxu0  ;;  %610 = vmatpush3.bf16.msra.mxu1 %v248_v46 }
 0x101   :  { %v249_v49 = vpack.c.bf16 %v591_v47, %v156_v48 }
 0x103   :  { %v594_v50 = vpop.f32.mrb[6].mxu0  ;;  %611 = vmatprep.subr.bf16.mxu1 %v249_v49 }
 0x104   :  { %v166_v51 = vpop.f32.mrb[7].mxu0  ;;  %612 = vmatpush3.bf16.msra.mxu1 %v249_v49 }
 0x105   :  { %v250_v52 = vpack.c.bf16 %v594_v50, %v166_v51 }
 0x107   :  { %v597_v53 = vpop.f32.mrb[8].mxu0  ;;  %613 = vmatprep.subr.bf16.mxu1 %v250_v52 }
 0x108   :  { %v176_v54 = vpop.f32.mrb[9].mxu0  ;;  %614 = vmatpush3.bf16.msra.mxu1 %v250_v52 }
 0x109   :  { %v251_v55 = vpack.c.bf16 %v597_v53, %v176_v54 }
 0x10b   :  { %v600_v56 = vpop.f32.mrb[10].mxu0  ;;  %615 = vmatprep.subr.bf16.mxu1 %v251_v55 }
 0x10c   :  { %v186_v57 = vpop.f32.mrb[11].mxu0  ;;  %616 = vmatpush3.bf16.msra.mxu1 %v251_v55 }
 0x10d   :  { %v252_v58 = vpack.c.bf16 %v600_v56, %v186_v57 }
 0x10f   :  { %v603_v59 = vpop.f32.mrb[12].mxu0  ;;  %617 = vmatprep.subr.bf16.mxu1 %v252_v58 }
 0x110   :  { %v196_v60 = vpop.f32.mrb[13].mxu0  ;;  %618 = vmatpush3.bf16.msra.mxu1 %v252_v58 }
 0x111   :  { %v253_v61 = vpack.c.bf16 %v603_v59, %v196_v60 }
 0x113   :  { %v606_v62 = vpop.f32.mrb[14].mxu0  ;;  %619 = vmatprep.subr.bf16.mxu1 %v253_v61 }
 0x114   :  { %v206_v63 = vpop.f32.mrb[15].mxu0  ;;  %620 = vmatpush3.bf16.msra.mxu1 %v253_v61 }
 0x115   :  { %v254_v0 = vpack.c.bf16 %v606_v62, %v206_v63 }
 0x117   :  { %621 = vmatprep.subr.bf16.mxu1 %v254_v0 }
 0x118   :  { %622 = vmatpush3.bf16.msra.mxu1 %v254_v0 }
 0x11b   :  { %624 = vmatmul.mubr.bf16.vlgmr.msra.gmra.mrb[0].mxu1 %v672_v1 }
 0x11c   :  { %627 = vmatprep.mubr.bf16.mxu1 %v673_v2 }
 0x123   :  { %628 = vmatmul.mubr.bf16.gmra.mrb[4].mxu1 %v674_v3 }
 0x124   :  { %631 = vmatprep.mubr.bf16.mxu1 %v675_v4 }
 0x12b   :  { %632 = vmatmul.mubr.bf16.gmra.mrb[8].mxu1 %v676_v5 }
 0x12c   :  { %635 = vmatprep.mubr.bf16.mxu1 %v677_v6 }
 0x133   :  { %636 = vmatmul.mubr.bf16.gmra.mrb[12].mxu1 %v678_v7 }
 0x1ee   :  { %v625_v9 = vpop.f32.mrb[0].mxu1 }
 0x1ef   :  { %v460_v10 = vadd.f32 %v625_v9, %v502_v8  ;;  %v337_v11 = vpop.f32.mrb[1].mxu1 }
 0x1f0   :  { %v458_v12 = vadd.f32 %v502_v8, %v337_v11  ;;  %v626_v13 = vpop.f32.mrb[2].mxu1 }
 0x1f1   :  { %476 = vst [vmem:[%s879_s4 + $0x10] sm:$0xff] %v460_v10  ;;  %v461_v14 = vadd.f32 %v626_v13, %v502_v8  ;;  %v340_v15 = vpop.f32.mrb[3].mxu1 }
 0x1f2   :  { %474 = vst [vmem:[%s879_s4] sm:$0xff] %v458_v12  ;;  %v459_v16 = vadd.f32 %v502_v8, %v340_v15 }
 0x1f3   :  { %477 = vst [vmem:[%s879_s4 + $0x18] sm:$0xff] %v461_v14 }
 0x1f4   :  { %475 = vst [vmem:[%s879_s4 + $0x8] sm:$0xff] %v459_v16 }
 0x1f6   :  { %v629_v17 = vpop.f32.mrb[4].mxu1 }
 0x1f7   :  { %v464_v18 = vadd.f32 %v629_v17, %v502_v8  ;;  %v353_v19 = vpop.f32.mrb[5].mxu1 }
 0x1f8   :  { %v462_v20 = vadd.f32 %v502_v8, %v353_v19  ;;  %v630_v21 = vpop.f32.mrb[6].mxu1 }
 0x1f9   :  { %480 = vst [vmem:[%s879_s4 + $0x30] sm:$0xff] %v464_v18  ;;  %v465_v22 = vadd.f32 %v630_v21, %v502_v8  ;;  %v356_v23 = vpop.f32.mrb[7].mxu1 }
 0x1fa   :  { %478 = vst [vmem:[%s879_s4 + $0x20] sm:$0xff] %v462_v20  ;;  %v463_v24 = vadd.f32 %v502_v8, %v356_v23 }
 0x1fb   :  { %481 = vst [vmem:[%s879_s4 + $0x38] sm:$0xff] %v465_v22 }
 0x1fc   :  { %479 = vst [vmem:[%s879_s4 + $0x28] sm:$0xff] %v463_v24 }
 0x1fe   :  { %v633_v25 = vpop.f32.mrb[8].mxu1 }
 0x1ff   :  { %v468_v26 = vadd.f32 %v633_v25, %v502_v8  ;;  %v369_v27 = vpop.f32.mrb[9].mxu1 }
 0x200   :  { %v466_v28 = vadd.f32 %v502_v8, %v369_v27  ;;  %v634_v29 = vpop.f32.mrb[10].mxu1 }
 0x201   :  { %484 = vst [vmem:[%s879_s4 + $0x50] sm:$0xff] %v468_v26  ;;  %v469_v30 = vadd.f32 %v634_v29, %v502_v8  ;;  %v372_v31 = vpop.f32.mrb[11].mxu1 }
 0x202   :  { %482 = vst [vmem:[%s879_s4 + $0x40] sm:$0xff] %v466_v28  ;;  %v467_v32 = vadd.f32 %v502_v8, %v372_v31 }
 0x203   :  { %485 = vst [vmem:[%s879_s4 + $0x58] sm:$0xff] %v469_v30 }
 0x204   :  { %483 = vst [vmem:[%s879_s4 + $0x48] sm:$0xff] %v467_v32 }
 0x206   :  { %v637_v33 = vpop.f32.mrb[12].mxu1 }
 0x207   :  { %v472_v34 = vadd.f32 %v637_v33, %v502_v8  ;;  %v385_v35 = vpop.f32.mrb[13].mxu1 }
 0x208   :  { %v470_v36 = vadd.f32 %v502_v8, %v385_v35  ;;  %v638_v37 = vpop.f32.mrb[14].mxu1 }
 0x209   :  { %488 = vst [vmem:[%s879_s4 + $0x70] sm:$0xff] %v472_v34  ;;  %v473_v38 = vadd.f32 %v638_v37, %v502_v8  ;;  %v388_v39 = vpop.f32.mrb[15].mxu1 }
 0x20a   :  { %486 = vst [vmem:[%s879_s4 + $0x60] sm:$0xff] %v470_v36  ;;  %v471_v40 = vadd.f32 %v502_v8, %v388_v39 }
 0x20b   :  { %489 = vst [vmem:[%s879_s4 + $0x78] sm:$0xff] %v473_v38 }
 0x20c   :  { %487 = vst [vmem:[%s879_s4 + $0x68] sm:$0xff] %v471_v40 }

// kernel: gcn_forward.3
= control target key start
LH: loop header
LB: loop body
LE: loop exit
PB: predicated region body
PF: predicated region fallthrough
CT: control target
= control target key end

     0   :  { %s891_s2 = inlined_call_operand.vmem [shape: f32[128,128], index: 2, kind: input, shape index: {}]   ;;  %s892_s1 = inlined_call_operand.vmem [shape: f32[128,128], index: 1, kind: input, shape index: {}]   ;;  %s893_s0 = inlined_call_operand.vmem [shape: bf16[128,128], index: 0, kind: input, shape index: {}]   ;;  %s894_s3 = inlined_call_operand.vmem [shape: f32[1,128], index: 3, kind: input, shape index: {}]   ;;  %s895_s4 = inlined_call_operand.vmem [shape: f32[128,128], index: 4, kind: output, shape index: {}]  }
   0x1   :  { %v70_v0 = vld [vmem:[%s891_s2] sm:$0xff]  ;;  %v71_v1 = vld [vmem:[%s891_s2 + $0x8] sm:$0xff]  ;;  %v72_v2 = vld [vmem:[%s891_s2 + $0x10] sm:$0xff] }
   0x2   :  { %v655_v3 = vpack.c.bf16 %v71_v1, %v70_v0  ;;  %v73_v4 = vld [vmem:[%s891_s2 + $0x18] sm:$0xff]  ;;  %v74_v6 = vld [vmem:[%s891_s2 + $0x20] sm:$0xff]  ;;  %v75_v7 = vld [vmem:[%s891_s2 + $0x28] sm:$0xff] }
   0x3   :  { %v659_v5 = vpack.c.bf16 %v73_v4, %v72_v2  ;;  %v663_v8 = vpack.c.bf16 %v75_v7, %v74_v6  ;;  %v38_v9 = vld [vmem:[%s892_s1] sm:$0xff]  ;;  %v76_v10 = vld [vmem:[%s891_s2 + $0x30] sm:$0xff]  ;;  %v77_v11 = vld [vmem:[%s891_s2 + $0x38] sm:$0xff] }
   0x4   :  { %656 = vmatprep.subr.bf16.mxu0 %v655_v3  ;;  %v54_v12 = vmax.f32 %v38_v9, 0.0  ;;  %v667_v13 = vpack.c.bf16 %v77_v11, %v76_v10  ;;  %v78_v14 = vld [vmem:[%s891_s2 + $0x40] sm:$0xff]  ;;  %v79_v15 = vld [vmem:[%s891_s2 + $0x48] sm:$0xff]  ;;  %v80_v17 = vld [vmem:[%s891_s2 + $0x50] sm:$0xff] }
   0x5   :  { %658 = vmatpush3.bf16.msra.mxu0 %v655_v3  ;;  %v671_v16 = vpack.c.bf16 %v79_v15, %v78_v14  ;;  %v81_v18 = vld [vmem:[%s891_s2 + $0x58] sm:$0xff]  ;;  %v82_v20 = vld [vmem:[%s891_s2 + $0x60] sm:$0xff]  ;;  %v83_v21 = vld [vmem:[%s891_s2 + $0x68] sm:$0xff] }
   0x6   :  { %660 = vmatprep.subr.bf16.mxu0 %v659_v5  ;;  %599 = vmatprep.mubr.f32.mxu0 %v54_v12  ;;  %v675_v19 = vpack.c.bf16 %v81_v18, %v80_v17  ;;  %v679_v22 = vpack.c.bf16 %v83_v21, %v82_v20  ;;  %v84_v23 = vld [vmem:[%s891_s2 + $0x70] sm:$0xff]  ;;  %v85_v24 = vld [vmem:[%s891_s2 + $0x78] sm:$0xff]  ;;  %v39_v26 = vld [vmem:[%s892_s1 + $0x8] sm:$0xff] }
   0x7   :  { %v683_v25 = vpack.c.bf16 %v85_v24, %v84_v23  ;;  %v40_v27 = vld [vmem:[%s892_s1 + $0x10] sm:$0xff]  ;;  %v55_v28 = vmax.f32 %v39_v26, 0.0  ;;  %v41_v30 = vld [vmem:[%s892_s1 + $0x18] sm:$0xff]  ;;  %v42_v31 = vld [vmem:[%s892_s1 + $0x20] sm:$0xff] }
   0x8   :  { %v56_v29 = vmax.f32 %v40_v27, 0.0  ;;  %v57_v32 = vmax.f32 %v41_v30, 0.0  ;;  %v58_v33 = vmax.f32 %v42_v31, 0.0  ;;  %v43_v34 = vld [vmem:[%s892_s1 + $0x28] sm:$0xff]  ;;  %v44_v35 = vld [vmem:[%s892_s1 + $0x30] sm:$0xff]  ;;  %v45_v38 = vld [vmem:[%s892_s1 + $0x38] sm:$0xff] }
   0x9   :  { %662 = vmatpush3.bf16.msra.mxu0 %v659_v5  ;;  %v59_v36 = vmax.f32 %v43_v34, 0.0  ;;  %v60_v37 = vmax.f32 %v44_v35, 0.0  ;;  %v46_v39 = vld [vmem:[%s892_s1 + $0x40] sm:$0xff]  ;;  %v61_v40 = vmax.f32 %v45_v38, 0.0  ;;  %v47_v42 = vld [vmem:[%s892_s1 + $0x48] sm:$0xff]  ;;  %v48_v43 = vld [vmem:[%s892_s1 + $0x50] sm:$0xff] }
   0xa   :  { %664 = vmatprep.subr.bf16.mxu0 %v663_v8  ;;  %v62_v41 = vmax.f32 %v46_v39, 0.0  ;;  %v63_v44 = vmax.f32 %v47_v42, 0.0  ;;  %v64_v45 = vmax.f32 %v48_v43, 0.0  ;;  %v49_v46 = vld [vmem:[%s892_s1 + $0x58] sm:$0xff]  ;;  %v50_v47 = vld [vmem:[%s892_s1 + $0x60] sm:$0xff]  ;;  %v51_v50 = vld [vmem:[%s892_s1 + $0x68] sm:$0xff] }
   0xb   :  { %v65_v48 = vmax.f32 %v49_v46, 0.0  ;;  %v66_v49 = vmax.f32 %v50_v47, 0.0  ;;  %v52_v51 = vld [vmem:[%s892_s1 + $0x70] sm:$0xff]  ;;  %v67_v52 = vmax.f32 %v51_v50, 0.0  ;;  %v53_v54 = vld [vmem:[%s892_s1 + $0x78] sm:$0xff]  ;;  %v687_v56 = vld [vmem:[%s893_s0] sm:$0xff]  }
   0xc   :  { %v68_v53 = vmax.f32 %v52_v51, 0.0  ;;  %v69_v55 = vmax.f32 %v53_v54, 0.0  ;;  %639 = vmatprep.mubr.bf16.mxu1 %v687_v56  ;;  %v688_v17 = vld [vmem:[%s893_s0 + $0x8] sm:$0xff]   ;;  %v689_v18 = vld [vmem:[%s893_s0 + $0x10] sm:$0xff]   ;;  %v691_v20 = vld [vmem:[%s893_s0 + $0x20] sm:$0xff]  }
   0xd   :  { %666 = vmatpush3.bf16.msra.mxu0 %v663_v8  ;;  %v692_v21 = vld [vmem:[%s893_s0 + $0x28] sm:$0xff]   ;;  %v694_v23 = vld [vmem:[%s893_s0 + $0x38] sm:$0xff]   ;;  %v518_v24 = vld [vmem:[%s894_s3] ss:$0 sm:$0xff] }
   0xe   :  { %668 = vmatprep.subr.bf16.mxu0 %v667_v13 }
  0x11   :  { %670 = vmatpush3.bf16.msra.mxu0 %v667_v13 }
  0x12   :  { %672 = vmatprep.subr.bf16.mxu0 %v671_v16 }
  0x15   :  { %674 = vmatpush3.bf16.msra.mxu0 %v671_v16 }
  0x16   :  { %676 = vmatprep.subr.bf16.mxu0 %v675_v19 }
  0x19   :  { %678 = vmatpush3.bf16.msra.mxu0 %v675_v19  ;;  %v690_v19 = vld [vmem:[%s893_s0 + $0x18] sm:$0xff]  }
  0x1a   :  { %680 = vmatprep.subr.bf16.mxu0 %v679_v22 }
  0x1d   :  { %682 = vmatpush3.bf16.msra.mxu0 %v679_v22  ;;  %v693_v22 = vld [vmem:[%s893_s0 + $0x30] sm:$0xff]  }
  0x1e   :  { %684 = vmatprep.subr.bf16.mxu0 %v683_v25 }
  0x21   :  { %686 = vmatpush3.bf16.msra.mxu0 %v683_v25 }
  0x24   :  { %600 = vmatmul.mubr.f32.vlgmr.msra.gmra.mrb[0].mxu0 %v55_v28 }
  0x25   :  { %602 = vmatprep.mubr.f32.mxu0 %v56_v29 }
  0x28   :  { %603 = vmatmul.mubr.f32.gmra.mrb[2].mxu0 %v57_v32 }
  0x29   :  { %605 = vmatprep.mubr.f32.mxu0 %v58_v33 }
  0x2c   :  { %606 = vmatmul.mubr.f32.gmra.mrb[4].mxu0 %v59_v36 }
  0x2d   :  { %608 = vmatprep.mubr.f32.mxu0 %v60_v37 }
  0x30   :  { %609 = vmatmul.mubr.f32.gmra.mrb[6].mxu0 %v61_v40 }
  0x31   :  { %611 = vmatprep.mubr.f32.mxu0 %v62_v41 }
  0x34   :  { %612 = vmatmul.mubr.f32.gmra.mrb[8].mxu0 %v63_v44 }
  0x35   :  { %614 = vmatprep.mubr.f32.mxu0 %v64_v45 }
  0x38   :  { %615 = vmatmul.mubr.f32.gmra.mrb[10].mxu0 %v65_v48 }
  0x39   :  { %617 = vmatprep.mubr.f32.mxu0 %v66_v49 }
  0x3c   :  { %618 = vmatmul.mubr.f32.gmra.mrb[12].mxu0 %v67_v52 }
  0x3d   :  { %620 = vmatprep.mubr.f32.mxu0 %v68_v53 }
  0x40   :  { %621 = vmatmul.mubr.f32.gmra.mrb[14].mxu0 %v69_v55 }
  0xf7   :  { %v601_v57 = vpop.f32.mrb[0].mxu0 }
  0xf8   :  { %v152_v58 = vpop.f32.mrb[1].mxu0 }
  0xf9   :  { %v263_v59 = vpack.c.bf16 %v601_v57, %v152_v58 }
  0xfb   :  { %v604_v60 = vpop.f32.mrb[2].mxu0  ;;  %623 = vmatprep.subr.bf16.mxu1 %v263_v59 }
  0xfc   :  { %v162_v61 = vpop.f32.mrb[3].mxu0  ;;  %624 = vmatpush3.bf16.msra.mxu1 %v263_v59 }
  0xfd   :  { %v264_v62 = vpack.c.bf16 %v604_v60, %v162_v61 }
  0xff   :  { %v607_v63 = vpop.f32.mrb[4].mxu0  ;;  %625 = vmatprep.subr.bf16.mxu1 %v264_v62 }
 0x100   :  { %v172_v0 = vpop.f32.mrb[5].mxu0  ;;  %626 = vmatpush3.bf16.msra.mxu1 %v264_v62 }
 0x101   :  { %v265_v1 = vpack.c.bf16 %v607_v63, %v172_v0 }
 0x103   :  { %v610_v2 = vpop.f32.mrb[6].mxu0  ;;  %627 = vmatprep.subr.bf16.mxu1 %v265_v1 }
 0x104   :  { %v182_v3 = vpop.f32.mrb[7].mxu0  ;;  %628 = vmatpush3.bf16.msra.mxu1 %v265_v1 }
 0x105   :  { %v266_v4 = vpack.c.bf16 %v610_v2, %v182_v3 }
 0x107   :  { %v613_v5 = vpop.f32.mrb[8].mxu0  ;;  %629 = vmatprep.subr.bf16.mxu1 %v266_v4 }
 0x108   :  { %v192_v6 = vpop.f32.mrb[9].mxu0  ;;  %630 = vmatpush3.bf16.msra.mxu1 %v266_v4 }
 0x109   :  { %v267_v7 = vpack.c.bf16 %v613_v5, %v192_v6 }
 0x10b   :  { %v616_v8 = vpop.f32.mrb[10].mxu0  ;;  %631 = vmatprep.subr.bf16.mxu1 %v267_v7 }
 0x10c   :  { %v202_v9 = vpop.f32.mrb[11].mxu0  ;;  %632 = vmatpush3.bf16.msra.mxu1 %v267_v7 }
 0x10d   :  { %v268_v10 = vpack.c.bf16 %v616_v8, %v202_v9 }
 0x10f   :  { %v619_v11 = vpop.f32.mrb[12].mxu0  ;;  %633 = vmatprep.subr.bf16.mxu1 %v268_v10 }
 0x110   :  { %v212_v12 = vpop.f32.mrb[13].mxu0  ;;  %634 = vmatpush3.bf16.msra.mxu1 %v268_v10 }
 0x111   :  { %v269_v13 = vpack.c.bf16 %v619_v11, %v212_v12 }
 0x113   :  { %v622_v14 = vpop.f32.mrb[14].mxu0  ;;  %635 = vmatprep.subr.bf16.mxu1 %v269_v13 }
 0x114   :  { %v222_v15 = vpop.f32.mrb[15].mxu0  ;;  %636 = vmatpush3.bf16.msra.mxu1 %v269_v13 }
 0x115   :  { %v270_v16 = vpack.c.bf16 %v622_v14, %v222_v15 }
 0x117   :  { %637 = vmatprep.subr.bf16.mxu1 %v270_v16 }
 0x118   :  { %638 = vmatpush3.bf16.msra.mxu1 %v270_v16 }
 0x11b   :  { %640 = vmatmul.mubr.bf16.vlgmr.msra.gmra.mrb[0].mxu1 %v688_v17 }
 0x11c   :  { %643 = vmatprep.mubr.bf16.mxu1 %v689_v18 }
 0x123   :  { %644 = vmatmul.mubr.bf16.gmra.mrb[4].mxu1 %v690_v19 }
 0x124   :  { %647 = vmatprep.mubr.bf16.mxu1 %v691_v20 }
 0x12b   :  { %648 = vmatmul.mubr.bf16.gmra.mrb[8].mxu1 %v692_v21 }
 0x12c   :  { %651 = vmatprep.mubr.bf16.mxu1 %v693_v22 }
 0x133   :  { %652 = vmatmul.mubr.bf16.gmra.mrb[12].mxu1 %v694_v23 }
 0x1ee   :  { %v641_v25 = vpop.f32.mrb[0].mxu1 }
 0x1ef   :  { %v476_v26 = vadd.f32 %v641_v25, %v518_v24  ;;  %v353_v27 = vpop.f32.mrb[1].mxu1 }
 0x1f0   :  { %v474_v28 = vadd.f32 %v518_v24, %v353_v27  ;;  %v642_v29 = vpop.f32.mrb[2].mxu1 }
 0x1f1   :  { %492 = vst [vmem:[%s895_s4 + $0x10] sm:$0xff] %v476_v26  ;;  %v477_v30 = vadd.f32 %v642_v29, %v518_v24  ;;  %v356_v31 = vpop.f32.mrb[3].mxu1 }
 0x1f2   :  { %490 = vst [vmem:[%s895_s4] sm:$0xff] %v474_v28  ;;  %v475_v32 = vadd.f32 %v518_v24, %v356_v31 }
 0x1f3   :  { %493 = vst [vmem:[%s895_s4 + $0x18] sm:$0xff] %v477_v30 }
 0x1f4   :  { %491 = vst [vmem:[%s895_s4 + $0x8] sm:$0xff] %v475_v32 }
 0x1f6   :  { %v645_v33 = vpop.f32.mrb[4].mxu1 }
 0x1f7   :  { %v480_v34 = vadd.f32 %v645_v33, %v518_v24  ;;  %v369_v35 = vpop.f32.mrb[5].mxu1 }
 0x1f8   :  { %v478_v36 = vadd.f32 %v518_v24, %v369_v35  ;;  %v646_v37 = vpop.f32.mrb[6].mxu1 }
 0x1f9   :  { %496 = vst [vmem:[%s895_s4 + $0x30] sm:$0xff] %v480_v34  ;;  %v481_v38 = vadd.f32 %v646_v37, %v518_v24  ;;  %v372_v39 = vpop.f32.mrb[7].mxu1 }
 0x1fa   :  { %494 = vst [vmem:[%s895_s4 + $0x20] sm:$0xff] %v478_v36  ;;  %v479_v40 = vadd.f32 %v518_v24, %v372_v39 }
 0x1fb   :  { %497 = vst [vmem:[%s895_s4 + $0x38] sm:$0xff] %v481_v38 }
 0x1fc   :  { %495 = vst [vmem:[%s895_s4 + $0x28] sm:$0xff] %v479_v40 }
 0x1fe   :  { %v649_v41 = vpop.f32.mrb[8].mxu1 }
 0x1ff   :  { %v484_v42 = vadd.f32 %v649_v41, %v518_v24  ;;  %v385_v43 = vpop.f32.mrb[9].mxu1 }
 0x200   :  { %v482_v44 = vadd.f32 %v518_v24, %v385_v43  ;;  %v650_v45 = vpop.f32.mrb[10].mxu1 }
 0x201   :  { %500 = vst [vmem:[%s895_s4 + $0x50] sm:$0xff] %v484_v42  ;;  %v485_v46 = vadd.f32 %v650_v45, %v518_v24  ;;  %v388_v47 = vpop.f32.mrb[11].mxu1 }
 0x202   :  { %498 = vst [vmem:[%s895_s4 + $0x40] sm:$0xff] %v482_v44  ;;  %v483_v48 = vadd.f32 %v518_v24, %v388_v47 }
 0x203   :  { %501 = vst [vmem:[%s895_s4 + $0x58] sm:$0xff] %v485_v46 }
 0x204   :  { %499 = vst [vmem:[%s895_s4 + $0x48] sm:$0xff] %v483_v48 }
 0x206   :  { %v653_v49 = vpop.f32.mrb[12].mxu1 }
 0x207   :  { %v488_v50 = vadd.f32 %v653_v49, %v518_v24  ;;  %v401_v51 = vpop.f32.mrb[13].mxu1 }
 0x208   :  { %v486_v52 = vadd.f32 %v518_v24, %v401_v51  ;;  %v654_v53 = vpop.f32.mrb[14].mxu1 }
 0x209   :  { %504 = vst [vmem:[%s895_s4 + $0x70] sm:$0xff] %v488_v50  ;;  %v489_v54 = vadd.f32 %v654_v53, %v518_v24  ;;  %v404_v55 = vpop.f32.mrb[15].mxu1 }
 0x20a   :  { %502 = vst [vmem:[%s895_s4 + $0x60] sm:$0xff] %v486_v52  ;;  %v487_v56 = vadd.f32 %v518_v24, %v404_v55 }
 0x20b   :  { %505 = vst [vmem:[%s895_s4 + $0x78] sm:$0xff] %v489_v54 }
 0x20c   :  { %503 = vst [vmem:[%s895_s4 + $0x68] sm:$0xff] %v487_v56 }

</bundles_post_ra>
